<compile_context>
chip_gen: v6e
topology: v6e:2x2x1
jax: 0.10.0
libtpu: 0.0.40
codegen_flags: <defaults>
</compile_context>

<pallas_src>
import jax
import jax.numpy as jnp
from jax.experimental import pallas as pl
from jax.experimental.pallas import tpu as pltpu

LANE = 128
SUBLANE = 8
_SLACK_BYTES = 2 * 1024 * 1024          # headroom for Mosaic-internal scratch / sems


def _round_up(x, m):
    return (x + m - 1) // m * m


def _vmem_limit_bytes():
    """Per-generation scoped-VMEM request (~3/4 of physical, capped at 100 MiB)."""
    phys = None
    try:
        phys = getattr(pltpu.get_tpu_info(), "vmem_capacity_bytes", None)
    except Exception:
        phys = None
    if not phys:
        phys = 64 * 1024 * 1024          # conservative (v7x-class) if unknown
    return int(min(phys * 3 // 4, 100 * 1024 * 1024))


def _pick_tile_rows(n_rows, per_row_bytes, resident_bytes, vmem_limit):
    """Largest row tile whose double-buffered activations + residents fit VMEM."""
    budget = vmem_limit - resident_bytes - _SLACK_BYTES
    if budget < per_row_bytes * SUBLANE:
        # TODO(synk): resident weights nearly fill VMEM (very large d_out on
        # v7x); add an N-tiling grid axis over the lgl matmuls or stream bf16
        # weights instead of relying on a minimal row tile.
        return min(n_rows, SUBLANE)
    cap = budget // per_row_bytes
    if n_rows <= cap:
        return n_rows                     # single full-extent row block
    return max(SUBLANE, (cap // SUBLANE) * SUBLANE)


# ---------------------------------------------------------------------------
# Pallas kernels
# ---------------------------------------------------------------------------
def _special_add_kernel(x_ref, c0_ref, wm_ref, bm_ref, w0p_ref, w1_ref, b1_ref,
                        o_ref):
    """One (batch, L-tile) step of the folded special-add chain:
         h   = x @ Wm + bm
         z   = h @ (I + W0) + (b0 - special @ W0)     # == h + lgl0(h - special)
         out = z @ W1 + b1
    Rows are independent, so ragged final L tiles (OOB rows read unspecified
    data, writes discarded) are safe.
    """
    h = (jnp.dot(x_ref[...], wm_ref[...], preferred_element_type=jnp.float32)
         + bm_ref[...])
    z = (jnp.dot(h.astype(w0p_ref.dtype), w0p_ref[...],
                 preferred_element_type=jnp.float32) + c0_ref[...])
    out = (jnp.dot(z.astype(w1_ref.dtype), w1_ref[...],
                   preferred_element_type=jnp.float32) + b1_ref[...])
    o_ref[...] = out.astype(o_ref.dtype)


def _model_only_kernel(x_ref, wm_ref, bm_ref, o_ref):
    """Path taken when `special is None`: just the model projection."""
    h = (jnp.dot(x_ref[...], wm_ref[...], preferred_element_type=jnp.float32)
         + bm_ref[...])
    o_ref[...] = h.astype(o_ref.dtype)


# ---------------------------------------------------------------------------
# Parameters + wrapper
# ---------------------------------------------------------------------------
def init_params(key, d_in, d_out, dtype=jnp.float32):
    ks = jax.random.split(key, 6)
    sm = 1.0 / float(d_in) ** 0.5
    sl = 1.0 / float(d_out) ** 0.5
    u = lambda k, shape, s: jax.random.uniform(k, shape, jnp.float32, -s, s)
    return {
        # weights stored [in, out] so the kernel does x @ W (== x @ W_torch.T)
        "wm": u(ks[0], (d_in, d_out), sm).astype(dtype),
        "bm": u(ks[1], (1, d_out), sm),               # biases kept f32 (f32 epilogue)
        "w0": u(ks[2], (d_out, d_out), sl).astype(dtype),
        "b0": u(ks[3], (1, d_out), sl),
        "w1": u(ks[4], (d_out, d_out), sl).astype(dtype),
        "b1": u(ks[5], (1, d_out), sl),
    }


def _weight_spec(shape, single_buffer):
    idx = lambda i: (0,) * len(shape)
    if single_buffer:
        # Grid-invariant block: fetched once, keep a single VMEM buffer.
        return pl.BlockSpec(shape, idx, pipeline_mode=pl.Buffered(1))
    return pl.BlockSpec(shape, idx)


def special_add_forward(params, x, special=None):
    """x: [B, L, d_in]; special: None or [B, d_out].  Returns [B, L, d_out]."""
    B, L, d_in = x.shape
    d_out = params["wm"].shape[1]
    w_dtype = params["wm"].dtype

    # VMEM accounting uses the (8,128)-padded sizes Mosaic actually allocates.
    d_in_vr = _round_up(d_in, LANE)
    d_out_vr = _round_up(d_out, LANE)
    x_bytes = jnp.dtype(x.dtype).itemsize
    out_bytes = x_bytes                           # output streamed in x.dtype
    w_bytes = jnp.dtype(w_dtype).itemsize
    vmem_limit = _vmem_limit_bytes()
    cparams = pltpu.CompilerParams(
        dimension_semantics=("parallel",),        # flat grid -> balanced megacore split
        vmem_limit_bytes=vmem_limit)

    if special is None:
        # Fold batches into the row dimension: one 2-D row-tiled projection.
        rows = B * L
        x2 = x.reshape(rows, d_in)
        per_row = 2 * (d_in_vr * x_bytes + d_out_vr * out_bytes) + d_out_vr * 4
        resident = d_in_vr * d_out_vr * w_bytes + d_out_vr * 4
        TL = _pick_tile_rows(rows, per_row, resident, vmem_limit)
        grid = (pl.cdiv(rows, TL),)
        last_err = None
        for single_buffer in (True, False):
            try:
                out = pl.pallas_call(
                    _model_only_kernel,
                    out_shape=jax.ShapeDtypeStruct((rows, d_out), x.dtype),
                    grid=grid,
                    in_specs=[pl.BlockSpec((TL, d_in), lambda i: (i, 0)),
                              _weight_spec((d_in, d_out), single_buffer),
                              _weight_spec((1, d_out), single_buffer)],
                    out_specs=pl.BlockSpec((TL, d_out), lambda i: (i, 0)),
                    compiler_params=cparams,
                )(x2, params["wm"], params["bm"])
                return out.reshape(B, L, d_out)
            except Exception as e:                # Buffered(1) rejected -> default buffering
                last_err = e
        raise last_err

    # ---- special-add path ---------------------------------------------------
    # Algebraic fold (exact up to f32 re-association):
    #   h + lgl0(h - special) = h @ (I + W0) + (b0 - special @ W0)
    f32 = jnp.float32
    w0p = (jnp.eye(d_out, dtype=f32) + params["w0"].astype(f32)).astype(w_dtype)
    c0 = (params["b0"]
          - jnp.dot(special.astype(w_dtype), params["w0"],
                    preferred_element_type=f32)).reshape(B, 1, d_out)

    # Double-buffered x/out tiles + ~3 live f32 intermediates per row; weights,
    # biases and the tiny per-batch c0 block counted as residents.
    per_row = 2 * (d_in_vr * x_bytes + d_out_vr * out_bytes) + 3 * d_out_vr * 4
    resident = ((d_in_vr * d_out_vr + 2 * d_out_vr * d_out_vr) * w_bytes
                + 2 * d_out_vr * 4                # bm, b1 (f32)
                + 2 * d_out_vr * 4)               # c0 block (double-buffered)
    TL = _pick_tile_rows(L, per_row, resident, vmem_limit)
    n_l = pl.cdiv(L, TL)

    # Flat 1-D grid over B * n_l steps (balanced across v7x's two TensorCores).
    x_spec = pl.BlockSpec((None, TL, d_in), lambda i: (i // n_l, i % n_l, 0))
    c_spec = pl.BlockSpec((None, 1, d_out), lambda i: (i // n_l, 0, 0))
    o_spec = pl.BlockSpec((None, TL, d_out), lambda i: (i // n_l, i % n_l, 0))
    # TODO(synk): when n_l == 1 and B is large, pack several batches per grid
    # step (per-batch c0 gathered via scalar prefetch) to amortize per-step cost.

    last_err = None
    for single_buffer in (True, False):
        try:
            out = pl.pallas_call(
                _special_add_kernel,
                out_shape=jax.ShapeDtypeStruct((B, L, d_out), x.dtype),
                grid=(B * n_l,),
                in_specs=[
                    x_spec,                                       # pipelined x tile
                    c_spec,                                       # per-batch b0 - special@W0
                    _weight_spec((d_in, d_out), single_buffer),   # Wm       (resident)
                    _weight_spec((1, d_out), single_buffer),      # bm       (resident)
                    _weight_spec((d_out, d_out), single_buffer),  # I + W0   (resident)
                    _weight_spec((d_out, d_out), single_buffer),  # W1       (resident)
                    _weight_spec((1, d_out), single_buffer),      # b1       (resident)
                ],
                out_specs=o_spec,
                compiler_params=cparams,
            )(x, c0, params["wm"], params["bm"], w0p, params["w1"], params["b1"])
            return out
        except Exception as e:                    # Buffered(1) rejected -> default buffering
            last_err = e
    raise last_err


# ---------------------------------------------------------------------------
# Reference + demo
# ---------------------------------------------------------------------------
def _reference(params, x, special=None):
    f32 = jnp.float32
    h = (jnp.einsum("bli,io->blo", x.astype(f32), params["wm"].astype(f32))
         + params["bm"][0])
    if special is None:
        return h
    s = special.astype(f32)[:, None, :]
    t = (jnp.einsum("blo,op->blp", h - s, params["w0"].astype(f32))
         + params["b0"][0])
    return (jnp.einsum("blo,op->blp", h + t, params["w1"].astype(f32))
            + params["b1"][0])


if __name__ == "__main__":
    B, L, D_IN, OUTPUT_SIZE = 2, 8, 32, 32

    key = jax.random.PRNGKey(0)
    k_par, k_x, k_s = jax.random.split(key, 3)

    params = init_params(k_par, D_IN, OUTPUT_SIZE, jnp.float32)
    x = jax.random.normal(k_x, (B, L, D_IN), jnp.float32)
    special = jax.random.normal(k_s, (B, OUTPUT_SIZE), jnp.float32)

    # ---- f32 path: `special is None` branch --------------------------------
    out_none = special_add_forward(params, x, special=None)
    jax.block_until_ready(out_none)
    assert out_none.shape == (B, L, OUTPUT_SIZE)
    assert jnp.allclose(out_none, _reference(params, x, None), atol=1e-4, rtol=1e-4)

    # ---- f32 path: special-add branch ---------------------------------------
    out = special_add_forward(params, x, special=special)
    jax.block_until_ready(out)
    ref = _reference(params, x, special)
    assert out.shape == (B, L, OUTPUT_SIZE)
    assert jnp.allclose(out, ref, atol=1e-4, rtol=1e-4)

    # ---- bf16 streaming path (bf16 weights/acts/out, f32 MXU accumulation) --
    params_bf16 = {k: (v.astype(jnp.bfloat16) if k in ("wm", "w0", "w1") else v)
                   for k, v in params.items()}
    out_bf16 = special_add_forward(params_bf16, x.astype(jnp.bfloat16),
                                   special=special.astype(jnp.bfloat16))
    jax.block_until_ready(out_bf16)
    assert out_bf16.shape == (B, L, OUTPUT_SIZE)
    assert jnp.allclose(out_bf16.astype(jnp.float32), ref, atol=2e-1, rtol=2e-1)

    print("KERNEL_OK")
</pallas_src>

<mosaic_0001>
module attributes {stable_mosaic.version = 11 : i64} {
  func.func @_model_only_kernel(%arg0: i32, %arg1: memref<16x32xf32, #tpu.memory_space<vmem>>, %arg2: memref<32x32xf32, #tpu.memory_space<vmem>>, %arg3: memref<1x32xf32, #tpu.memory_space<vmem>>, %arg4: memref<16x32xf32, #tpu.memory_space<vmem>>) attributes {dimension_semantics = [#tpu.dimension_semantics<parallel>], iteration_bounds = array<i64: 1>, scalar_prefetch = 0 : i64, scratch_operands = 0 : i64, tpu.core_type = #tpu.core_type<tc>, window_params = [{transform_indices = @transform_0, window_bounds = array<i64: 16, 32>}, {pipeline_mode = #tpu.pipeline_mode<synchronous>, transform_indices = @transform_1, window_bounds = array<i64: 32, 32>}, {pipeline_mode = #tpu.pipeline_mode<synchronous>, transform_indices = @transform_2, window_bounds = array<i64: 1, 32>}, {transform_indices = @transform_3, window_bounds = array<i64: 16, 32>}]} {
    %c0 = arith.constant 0 : index
    %c0_0 = arith.constant 0 : index
    %0 = vector.load %arg1[%c0, %c0_0] : memref<16x32xf32, #tpu.memory_space<vmem>>, vector<16x32xf32>
    %c0_1 = arith.constant 0 : index
    %c0_2 = arith.constant 0 : index
    %1 = vector.load %arg2[%c0_1, %c0_2] : memref<32x32xf32, #tpu.memory_space<vmem>>, vector<32x32xf32>
    %cst = arith.constant dense<0.000000e+00> : vector<16x32xf32>
    %2 = tpu.matmul %0, %1, %cst {dimension_numbers = #tpu.dot_dimension_numbers<[1], [0], [0], [1], [0, 0, 1, 1], [], []>} : vector<16x32xf32>, vector<32x32xf32>, vector<16x32xf32> -> vector<16x32xf32>
    %c0_3 = arith.constant 0 : index
    %c0_4 = arith.constant 0 : index
    %3 = vector.load %arg3[%c0_3, %c0_4] : memref<1x32xf32, #tpu.memory_space<vmem>>, vector<1x32xf32>
    %4 = vector.broadcast %3 : vector<1x32xf32> to vector<16x32xf32>
    %5 = arith.addf %2, %4 : vector<16x32xf32>
    %c0_5 = arith.constant 0 : index
    %c0_6 = arith.constant 0 : index
    %6 = vector.load %arg4[%c0_5, %c0_6] : memref<16x32xf32, #tpu.memory_space<vmem>>, vector<16x32xf32>
    tpu.vector_store %arg4[%c0_5, %c0_6], %5 {strides = array<i32>} : memref<16x32xf32, #tpu.memory_space<vmem>>, vector<16x32xf32>,
    return
  }
  func.func @transform_0(%arg0: i32) -> (i32, i32) {
    %c0_i32 = arith.constant 0 : i32
    %c0_i32_0 = arith.constant 0 : i32
    return %arg0, %c0_i32 : i32, i32
  }
  func.func @transform_1(%arg0: i32) -> (i32, i32) {
    %c0_i32 = arith.constant 0 : i32
    %c0_i32_0 = arith.constant 0 : i32
    %c0_i32_1 = arith.constant 0 : i32
    return %c0_i32, %c0_i32_0 : i32, i32
  }
  func.func @transform_2(%arg0: i32) -> (i32, i32) {
    %c0_i32 = arith.constant 0 : i32
    %c0_i32_0 = arith.constant 0 : i32
    %c0_i32_1 = arith.constant 0 : i32
    return %c0_i32, %c0_i32_0 : i32, i32
  }
  func.func @transform_3(%arg0: i32) -> (i32, i32) {
    %c0_i32 = arith.constant 0 : i32
    %c0_i32_0 = arith.constant 0 : i32
    return %arg0, %c0_i32 : i32, i32
  }
}

module attributes {stable_mosaic.version = 11 : i64} {
  func.func @_model_only_kernel(%arg0: i32, %arg1: memref<16x32xf32, #tpu.memory_space<vmem>>, %arg2: memref<32x32xf32, #tpu.memory_space<vmem>>, %arg3: memref<1x32xf32, #tpu.memory_space<vmem>>, %arg4: memref<16x32xf32, #tpu.memory_space<vmem>>) attributes {dimension_semantics = [#tpu.dimension_semantics<parallel>], iteration_bounds = array<i64: 1>, scalar_prefetch = 0 : i64, scratch_operands = 0 : i64, tpu.core_type = #tpu.core_type<tc>, window_params = [{transform_indices = @transform_0, window_bounds = array<i64: 16, 32>}, {pipeline_mode = #tpu.pipeline_mode<synchronous>, transform_indices = @transform_1, window_bounds = array<i64: 32, 32>}, {pipeline_mode = #tpu.pipeline_mode<synchronous>, transform_indices = @transform_2, window_bounds = array<i64: 1, 32>}, {transform_indices = @transform_3, window_bounds = array<i64: 16, 32>}]} {
    %c0 = arith.constant 0 : index
    %c0_0 = arith.constant 0 : index
    %0 = vector.load %arg1[%c0, %c0_0] : memref<16x32xf32, #tpu.memory_space<vmem>>, vector<16x32xf32>
    %c0_1 = arith.constant 0 : index
    %c0_2 = arith.constant 0 : index
    %1 = vector.load %arg2[%c0_1, %c0_2] : memref<32x32xf32, #tpu.memory_space<vmem>>, vector<32x32xf32>
    %cst = arith.constant dense<0.000000e+00> : vector<16x32xf32>
    %2 = tpu.matmul %0, %1, %cst {dimension_numbers = #tpu.dot_dimension_numbers<[1], [0], [0], [1], [0, 0, 1, 1], [], []>} : vector<16x32xf32>, vector<32x32xf32>, vector<16x32xf32> -> vector<16x32xf32>
    %c0_3 = arith.constant 0 : index
    %c0_4 = arith.constant 0 : index
    %3 = vector.load %arg3[%c0_3, %c0_4] : memref<1x32xf32, #tpu.memory_space<vmem>>, vector<1x32xf32>
    %4 = vector.broadcast %3 : vector<1x32xf32> to vector<16x32xf32>
    %5 = arith.addf %2, %4 : vector<16x32xf32>
    %c0_5 = arith.constant 0 : index
    %c0_6 = arith.constant 0 : index
    %6 = vector.load %arg4[%c0_5, %c0_6] : memref<16x32xf32, #tpu.memory_space<vmem>>, vector<16x32xf32>
    tpu.vector_store %arg4[%c0_5, %c0_6], %5 {strides = array<i32>} : memref<16x32xf32, #tpu.memory_space<vmem>>, vector<16x32xf32>,
    return
  }
  func.func @transform_0(%arg0: i32) -> (i32, i32) {
    %c0_i32 = arith.constant 0 : i32
    %c0_i32_0 = arith.constant 0 : i32
    return %arg0, %c0_i32 : i32, i32
  }
  func.func @transform_1(%arg0: i32) -> (i32, i32) {
    %c0_i32 = arith.constant 0 : i32
    %c0_i32_0 = arith.constant 0 : i32
    %c0_i32_1 = arith.constant 0 : i32
    return %c0_i32, %c0_i32_0 : i32, i32
  }
  func.func @transform_2(%arg0: i32) -> (i32, i32) {
    %c0_i32 = arith.constant 0 : i32
    %c0_i32_0 = arith.constant 0 : i32
    %c0_i32_1 = arith.constant 0 : i32
    return %c0_i32, %c0_i32_0 : i32, i32
  }
  func.func @transform_3(%arg0: i32) -> (i32, i32) {
    %c0_i32 = arith.constant 0 : i32
    %c0_i32_0 = arith.constant 0 : i32
    return %arg0, %c0_i32 : i32, i32
  }
}

</mosaic_0001>

<bundles_post_ra>
// kernel: tpu_custom_call.1
= control target key start
LH: loop header
LB: loop body
LE: loop exit
PB: predicated region body
PF: predicated region fallthrough
CT: control target
= control target key end

     0   :  { %8 = vsyncpa [#allocation3], 0  ;;  %s299_s0 = inlined_call_operand.hbm [shape: f32[16,32], index: 0, kind: input, shape index: {}]   ;;  %s300_s1 = inlined_call_operand.hbm [shape: f32[32,32], index: 1, kind: input, shape index: {}]   ;;  %s301_s2 = inlined_call_operand.vmem [shape: f32[1,32], index: 2, kind: input, shape index: {}]   ;;  %s302_s3 = inlined_call_operand.hbm [shape: f32[16,32], index: 3, kind: output, shape index: {}]  }
   0x1   :  { %9 = vsyncpa [#allocation6], 0 }
   0x2   :  { %10 = vsyncpa [#allocation4], 0  ;;  %s249_s12 = smov [#allocation2]  }
   0x3   :  { %s16_s13 = sshll.u32 %s249_s12, 4  ;;  %s17_s13 = int_to_ptr.vmem [resolvable:$true] %s16_s13 }
   0x4   :  { %s191_s14 = scalar_lea.vmem %s17_s13, 256  ;;  %p196_p1 = scmp.lt.s32.totalorder %s17_s13, %s17_s13 }
   0x5   :  { %p192_p0 = scmp.ne.s32.totalorder %s17_s13, %s191_s14  ;;  %p197_p2 = scmp.lt.s32.totalorder %s191_s14, %s191_s14 }
   0x7   :  { %p198_p3 = por %p197_p2, %p196_p1 }
   0x9   :  { %p199_p4 = pnand %p198_p3, %p192_p0 }
   0xb   :  { %202 = shalt.err (!%p199_p4)
}
   0xc   :  { %s250_s15 = smov 128   ;;  %s251_s16 = smov 8  }
   0xd   :  { %22 = dma.hbm_to_vmem [thread:$0]  %s299_s0, 256, %s17_s13, [#allocation3], %s250_s15, %s250_s15, %s251_s16  }
   0xe   :  { %s252_s19 = smov [#allocation5]  }
   0xf   :  { %s28_s20 = sshll.u32 %s252_s19, 4  ;;  %s29_s20 = int_to_ptr.vmem [resolvable:$true] %s28_s20 }
  0x10   :  { %s211_s21 = scalar_lea.vmem %s29_s20, 512  ;;  %p216_p6 = scmp.lt.s32.totalorder %s29_s20, %s29_s20 }
  0x11   :  { %p212_p5 = scmp.ne.s32.totalorder %s29_s20, %s211_s21  ;;  %p217_p7 = scmp.lt.s32.totalorder %s211_s21, %s211_s21 }
  0x13   :  { %p218_p8 = por %p217_p7, %p216_p6 }
  0x15   :  { %p219_p9 = pnand %p218_p8, %p212_p5 }
  0x17   :  { %222 = shalt.err (!%p219_p9)
}
  0x18   :  { %34 = dma.hbm_to_vmem [thread:$0]  %s300_s1, 512, %s29_s20, [#allocation6], %s250_s15, %s250_s15, %s251_s16  }
  0x19   :  { %243 = dma.done.wait [#allocation3], 256  }
  0x1a   :  { %244 = vsyncadd [#allocation3], 4294967040 }
  0x1b   :  { %245 = dma.done.wait [#allocation6], 512  }
  0x1c   :  { %246 = vsyncadd [#allocation6], 4294966784  ;;  %vm56_vm0 = vcmask 261120   ;;  %v48_v0 = vld [vmem:[#allocation5 + $0x18] sm:$0xff]  ;;  %v47_v1 = vld [vmem:[#allocation5 + $0x10] sm:$0xff]  ;;  %s253_s24 = smov [#allocation7]  }
  0x1d   :  { %167 = vmatprep.subr.mxu0 %v48_v0  ;;  %v43_v2 = vld [vmem:[#allocation2] sm:$0xff]  ;;  %v46_v3 = vld [vmem:[#allocation5 + $0x8] sm:$0xff]  ;;  %v45_v4 = vld [vmem:[#allocation5] sm:$0xff]  ;;  %s145_s25 = sshll.u32 %s253_s24, 4  ;;  %s146_s25 = int_to_ptr.vmem [resolvable:$true] %s145_s25 }
  0x1e   :  { %168 = vmatpush3.msra.mxu0 %v48_v0  ;;  %175 = vmatprep.mubr.msk.f32.mxu0 %vm56_vm0, %v43_v2  ;;  %v44_v5 = vld [vmem:[#allocation2 + $0x8] sm:$0xff]  ;;  %v158_v6 = vld [vmem:[%s301_s2] ss:$0 sm:$0xff]  ;;  %s223_s26 = scalar_lea.vmem %s146_s25, 256  ;;  %p228_p11 = scmp.lt.s32.totalorder %s146_s25, %s146_s25 }
  0x1f   :  { %169 = vmatprep.subr.mxu0 %v47_v1  ;;  %p224_p10 = scmp.ne.s32.totalorder %s146_s25, %s223_s26  ;;  %p229_p12 = scmp.lt.s32.totalorder %s223_s26, %s223_s26 }
  0x20   :  { %170 = vmatpush3.msra.mxu0 %v47_v1 }
  0x21   :  { %171 = vmatprep.subr.mxu0 %v46_v3  ;;  %p230_p13 = por %p229_p12, %p228_p11 }
  0x22   :  { %172 = vmatpush3.msra.mxu0 %v46_v3 }
  0x23   :  { %173 = vmatprep.subr.mxu0 %v45_v4  ;;  %p231_p0 = pnand %p230_p13, %p224_p10 }
  0x24   :  { %174 = vmatpush3.msra.mxu0 %v45_v4 }
  0x25   :  { %176 = vmatmul.mubr.msk.f32.vlgmr.msra.gmra.mxu0 %vm56_vm0, %v44_v5 }
  0xe5   :  { %v177_v7 = vpop.f32.mrf.mxu0 }
  0xe6   :  { %v135_v8 = vadd.f32 %v177_v7, %v158_v6 }
  0xe7   :  { %v129_v9 = vpop.f32.mrf.mxu0 }
  0xe8   :  { %139 = vst.msk [vmem:[#allocation7 + $0x8] sm:$0xff] %vm56_vm0, %v135_v8  ;;  %v130_v10 = vadd.f32 %v158_v6, %v129_v9 }
  0xea   :  { %138 = vst.msk [vmem:[#allocation7] sm:$0xff] %vm56_vm0, %v130_v10 }
  0xeb   :  { %234 = shalt.err (!%p231_p0)
}
  0xec   :  { %151 = dma.vmem_to_hbm [thread:$0]  %s146_s25, 256, %s302_s3, [#allocation4], %s250_s15, %s250_s15, %s251_s16  }
  0xed   :  { %247 = dma.done.wait [#allocation4], 256  }
  0xee   :  { %248 = vsyncadd [#allocation4], 4294967040 }
  0xef   :  { %155 = vsyncpa [#allocation3], 1 }
  0xf0   :  { %156 = vsyncpa [#allocation6], 1 }
  0xf1   :  { %157 = vsyncpa [#allocation4], 1 }

// kernel: tpu_custom_call.1
= control target key start
LH: loop header
LB: loop body
LE: loop exit
PB: predicated region body
PF: predicated region fallthrough
CT: control target
= control target key end

     0   :  { %8 = vsyncpa [#allocation3], 0  ;;  %s299_s0 = inlined_call_operand.hbm [shape: f32[16,32], index: 0, kind: input, shape index: {}]   ;;  %s300_s1 = inlined_call_operand.hbm [shape: f32[32,32], index: 1, kind: input, shape index: {}]   ;;  %s301_s2 = inlined_call_operand.vmem [shape: f32[1,32], index: 2, kind: input, shape index: {}]   ;;  %s302_s3 = inlined_call_operand.hbm [shape: f32[16,32], index: 3, kind: output, shape index: {}]  }
   0x1   :  { %9 = vsyncpa [#allocation6], 0 }
   0x2   :  { %10 = vsyncpa [#allocation4], 0  ;;  %s249_s12 = smov [#allocation2]  }
   0x3   :  { %s16_s13 = sshll.u32 %s249_s12, 4  ;;  %s17_s13 = int_to_ptr.vmem [resolvable:$true] %s16_s13 }
   0x4   :  { %s191_s14 = scalar_lea.vmem %s17_s13, 256  ;;  %p196_p1 = scmp.lt.s32.totalorder %s17_s13, %s17_s13 }
   0x5   :  { %p192_p0 = scmp.ne.s32.totalorder %s17_s13, %s191_s14  ;;  %p197_p2 = scmp.lt.s32.totalorder %s191_s14, %s191_s14 }
   0x7   :  { %p198_p3 = por %p197_p2, %p196_p1 }
   0x9   :  { %p199_p4 = pnand %p198_p3, %p192_p0 }
   0xb   :  { %202 = shalt.err (!%p199_p4)
}
   0xc   :  { %s250_s15 = smov 128   ;;  %s251_s16 = smov 8  }
   0xd   :  { %22 = dma.hbm_to_vmem [thread:$0]  %s299_s0, 256, %s17_s13, [#allocation3], %s250_s15, %s250_s15, %s251_s16  }
   0xe   :  { %s252_s19 = smov [#allocation5]  }
   0xf   :  { %s28_s20 = sshll.u32 %s252_s19, 4  ;;  %s29_s20 = int_to_ptr.vmem [resolvable:$true] %s28_s20 }
  0x10   :  { %s211_s21 = scalar_lea.vmem %s29_s20, 512  ;;  %p216_p6 = scmp.lt.s32.totalorder %s29_s20, %s29_s20 }
  0x11   :  { %p212_p5 = scmp.ne.s32.totalorder %s29_s20, %s211_s21  ;;  %p217_p7 = scmp.lt.s32.totalorder %s211_s21, %s211_s21 }
  0x13   :  { %p218_p8 = por %p217_p7, %p216_p6 }
  0x15   :  { %p219_p9 = pnand %p218_p8, %p212_p5 }
  0x17   :  { %222 = shalt.err (!%p219_p9)
}
  0x18   :  { %34 = dma.hbm_to_vmem [thread:$0]  %s300_s1, 512, %s29_s20, [#allocation6], %s250_s15, %s250_s15, %s251_s16  }
  0x19   :  { %243 = dma.done.wait [#allocation3], 256  }
  0x1a   :  { %244 = vsyncadd [#allocation3], 4294967040 }
  0x1b   :  { %245 = dma.done.wait [#allocation6], 512  }
  0x1c   :  { %246 = vsyncadd [#allocation6], 4294966784  ;;  %vm56_vm0 = vcmask 261120   ;;  %v48_v0 = vld [vmem:[#allocation5 + $0x18] sm:$0xff]  ;;  %v47_v1 = vld [vmem:[#allocation5 + $0x10] sm:$0xff]  ;;  %s253_s24 = smov [#allocation7]  }
  0x1d   :  { %167 = vmatprep.subr.mxu0 %v48_v0  ;;  %v43_v2 = vld [vmem:[#allocation2] sm:$0xff]  ;;  %v46_v3 = vld [vmem:[#allocation5 + $0x8] sm:$0xff]  ;;  %v45_v4 = vld [vmem:[#allocation5] sm:$0xff]  ;;  %s145_s25 = sshll.u32 %s253_s24, 4  ;;  %s146_s25 = int_to_ptr.vmem [resolvable:$true] %s145_s25 }
  0x1e   :  { %168 = vmatpush3.msra.mxu0 %v48_v0  ;;  %175 = vmatprep.mubr.msk.f32.mxu0 %vm56_vm0, %v43_v2  ;;  %v44_v5 = vld [vmem:[#allocation2 + $0x8] sm:$0xff]  ;;  %v158_v6 = vld [vmem:[%s301_s2] ss:$0 sm:$0xff]  ;;  %s223_s26 = scalar_lea.vmem %s146_s25, 256  ;;  %p228_p11 = scmp.lt.s32.totalorder %s146_s25, %s146_s25 }
  0x1f   :  { %169 = vmatprep.subr.mxu0 %v47_v1  ;;  %p224_p10 = scmp.ne.s32.totalorder %s146_s25, %s223_s26  ;;  %p229_p12 = scmp.lt.s32.totalorder %s223_s26, %s223_s26 }
  0x20   :  { %170 = vmatpush3.msra.mxu0 %v47_v1 }
  0x21   :  { %171 = vmatprep.subr.mxu0 %v46_v3  ;;  %p230_p13 = por %p229_p12, %p228_p11 }
  0x22   :  { %172 = vmatpush3.msra.mxu0 %v46_v3 }
  0x23   :  { %173 = vmatprep.subr.mxu0 %v45_v4  ;;  %p231_p0 = pnand %p230_p13, %p224_p10 }
  0x24   :  { %174 = vmatpush3.msra.mxu0 %v45_v4 }
  0x25   :  { %176 = vmatmul.mubr.msk.f32.vlgmr.msra.gmra.mxu0 %vm56_vm0, %v44_v5 }
  0xe5   :  { %v177_v7 = vpop.f32.mrf.mxu0 }
  0xe6   :  { %v135_v8 = vadd.f32 %v177_v7, %v158_v6 }
  0xe7   :  { %v129_v9 = vpop.f32.mrf.mxu0 }
  0xe8   :  { %139 = vst.msk [vmem:[#allocation7 + $0x8] sm:$0xff] %vm56_vm0, %v135_v8  ;;  %v130_v10 = vadd.f32 %v158_v6, %v129_v9 }
  0xea   :  { %138 = vst.msk [vmem:[#allocation7] sm:$0xff] %vm56_vm0, %v130_v10 }
  0xeb   :  { %234 = shalt.err (!%p231_p0)
}
  0xec   :  { %151 = dma.vmem_to_hbm [thread:$0]  %s146_s25, 256, %s302_s3, [#allocation4], %s250_s15, %s250_s15, %s251_s16  }
  0xed   :  { %247 = dma.done.wait [#allocation4], 256  }
  0xee   :  { %248 = vsyncadd [#allocation4], 4294967040 }
  0xef   :  { %155 = vsyncpa [#allocation3], 1 }
  0xf0   :  { %156 = vsyncpa [#allocation6], 1 }
  0xf1   :  { %157 = vsyncpa [#allocation4], 1 }

</bundles_post_ra>
